<compile_context>
chip_gen: v7x
topology: tpu7x:2x2x1
jax: 0.10.0
libtpu: 0.0.40
codegen_flags: <defaults>
</compile_context>

<pallas_src>
import jax
import jax.numpy as jnp
from jax.experimental import pallas as pl
from jax.experimental.pallas import tpu as pltpu

LN_EPS = 1e-5  # PyTorch LayerNorm default


def _round_up(x, m):
    return ((x + m - 1) // m) * m


def _layernorm(x, gamma, beta):
    # x: [B, N] f32, gamma/beta: [1, N] f32; biased variance (matches torch.nn.LayerNorm)
    mean = jnp.mean(x, axis=-1, keepdims=True)
    cent = x - mean
    var = jnp.mean(cent * cent, axis=-1, keepdims=True)
    inv = jax.lax.rsqrt(var + LN_EPS)
    return cent * inv * gamma + beta


def ddpg_critic_kernel(
    state_ref, action_ref,
    w1_ref, b1_ref, g1_ref, be1_ref,
    w2a_ref, w2b_ref, b2_ref, g2_ref, be2_ref,
    w3t_ref, b3_ref,
    out_ref,
):
    # Read params once (hoisted broadcasts; no per-iteration re-materialization).
    w1 = w1_ref[...]          # [obs, 400] bf16
    b1 = b1_ref[...]          # [1, 400] f32
    g1 = g1_ref[...]
    be1 = be1_ref[...]
    w2a = w2a_ref[...]        # [400, 300] bf16
    w2b = w2b_ref[...]        # [act, 300] bf16
    b2 = b2_ref[...]
    g2 = g2_ref[...]
    be2 = be2_ref[...]
    w3t = w3t_ref[...]        # [1, 300] f32
    b3 = b3_ref[...]          # [1, 1]   f32

    state = state_ref[...].astype(jnp.bfloat16)    # [TB, obs]
    action = action_ref[...].astype(jnp.bfloat16)  # [TB, act]

    # --- obs_net: Linear -> LayerNorm -> ReLU (MXU bf16, f32 accumulate) ---
    h1 = jnp.dot(state, w1, preferred_element_type=jnp.float32) + b1
    o1 = jnp.maximum(_layernorm(h1, g1, be1), 0.0)                 # [TB, 400] f32

    # --- out_net first Linear(400+act -> 300); concat folded into two matmuls ---
    h2 = (jnp.dot(o1.astype(jnp.bfloat16), w2a, preferred_element_type=jnp.float32)
          + jnp.dot(action, w2b, preferred_element_type=jnp.float32)
          + b2)
    o2 = jnp.maximum(_layernorm(h2, g2, be2), 0.0)                 # [TB, 300] f32

    # --- final Linear(300 -> 1) on VPU/XLU: mul + lane reduction (skip MXU) ---
    q = jnp.sum(o2 * w3t, axis=-1, keepdims=True) + b3             # [TB, 1]
    out_ref[...] = q.astype(out_ref.dtype)


def ddpg_critic_forward(state, action, params, *, tile_b=512):
    B, obs = state.shape
    act = action.shape[1]

    # Tile of at most `tile_b` rows; for small batches, a single 8-aligned tile.
    tb = min(tile_b, _round_up(B, 8))
    b_pad = _round_up(B, tb)
    if b_pad != B:
        pad = b_pad - B
        state = jnp.pad(state, ((0, pad), (0, 0)))
        action = jnp.pad(action, ((0, pad), (0, 0)))
    grid = (b_pad // tb,)

    p = params
    weights = (
        p["w1"], p["b1"], p["g1"], p["be1"],
        p["w2a"], p["w2b"], p["b2"], p["g2"], p["be2"],
        p["w3t"], p["b3"],
    )

    def tile_spec(feat):
        return pl.BlockSpec((tb, feat), lambda i: (i, 0))

    def resident_spec(arr):
        # Constant index_map: DMA'd once, stays resident across batch tiles.
        return pl.BlockSpec(arr.shape, lambda i: (0, 0))

    in_specs = [tile_spec(obs), tile_spec(act)] + [resident_spec(w) for w in weights]

    out = pl.pallas_call(
        ddpg_critic_kernel,
        grid=grid,
        in_specs=in_specs,
        out_specs=pl.BlockSpec((tb, 1), lambda i: (i, 0)),
        out_shape=jax.ShapeDtypeStruct((b_pad, 1), jnp.float32),
        compiler_params=pltpu.CompilerParams(
            dimension_semantics=("parallel",),  # shard batch tiles across TCs on v7x
        ),
    )(state, action, *weights)
    return out[:B]


def make_params(key, obs_size, act_size, h1=400, h2=300):
    ks = jax.random.split(key, 10)
    scale = 0.05
    w1 = (scale * jax.random.normal(ks[0], (obs_size, h1), jnp.float32)).astype(jnp.bfloat16)
    b1 = scale * jax.random.normal(ks[1], (1, h1), jnp.float32)
    # LayerNorm affine params (PyTorch inits ones/zeros; perturb deterministically)
    g1 = 1.0 + 0.1 * jax.random.normal(ks[2], (1, h1), jnp.float32)
    be1 = 0.1 * jax.random.normal(ks[3], (1, h1), jnp.float32)
    w2 = scale * jax.random.normal(ks[4], (h1 + act_size, h2), jnp.float32)
    w2a = w2[:h1].astype(jnp.bfloat16)
    w2b = w2[h1:].astype(jnp.bfloat16)
    b2 = scale * jax.random.normal(ks[5], (1, h2), jnp.float32)
    g2 = 1.0 + 0.1 * jax.random.normal(ks[6], (1, h2), jnp.float32)
    be2 = 0.1 * jax.random.normal(ks[7], (1, h2), jnp.float32)
    w3t = scale * jax.random.normal(ks[8], (1, h2), jnp.float32)   # stored transposed [1, 300]
    b3 = scale * jax.random.normal(ks[9], (1, 1), jnp.float32)
    return dict(w1=w1, b1=b1, g1=g1, be1=be1,
                w2a=w2a, w2b=w2b, b2=b2, g2=g2, be2=be2,
                w3t=w3t, b3=b3)


def reference_forward(state, action, p):
    # Pure-JAX f32 reference (bf16 weights upcast).
    w1 = p["w1"].astype(jnp.float32)
    w2a = p["w2a"].astype(jnp.float32)
    w2b = p["w2b"].astype(jnp.float32)
    h1 = state @ w1 + p["b1"]
    m = h1.mean(-1, keepdims=True)
    v = ((h1 - m) ** 2).mean(-1, keepdims=True)
    o1 = jnp.maximum((h1 - m) / jnp.sqrt(v + LN_EPS) * p["g1"] + p["be1"], 0.0)
    h2 = o1 @ w2a + action @ w2b + p["b2"]
    m2 = h2.mean(-1, keepdims=True)
    v2 = ((h2 - m2) ** 2).mean(-1, keepdims=True)
    o2 = jnp.maximum((h2 - m2) / jnp.sqrt(v2 + LN_EPS) * p["g2"] + p["be2"], 0.0)
    return (o2 * p["w3t"]).sum(-1, keepdims=True) + p["b3"]


if __name__ == "__main__":
    B, OBS, ACT = 2, 16, 8
    key = jax.random.PRNGKey(0)
    k_state, k_action, k_params = jax.random.split(key, 3)

    state = jax.random.normal(k_state, (B, OBS), jnp.float32)
    action = jax.random.normal(k_action, (B, ACT), jnp.float32)
    params = make_params(k_params, OBS, ACT)

    q = ddpg_critic_forward(state, action, params)
    q = jax.block_until_ready(q)

    q_ref = reference_forward(state, action, params)
    assert q.shape == (B, 1)
    assert jnp.allclose(q, q_ref, rtol=3e-2, atol=3e-2), (q, q_ref)

    print("KERNEL_OK")
</pallas_src>

<mosaic_0001>
module attributes {stable_mosaic.version = 11 : i64} {
  func.func @ddpg_critic_kernel(%arg0: i32, %arg1: memref<8x16xf32, #tpu.memory_space<vmem>>, %arg2: memref<8x8xf32, #tpu.memory_space<vmem>>, %arg3: memref<16x400xbf16, #tpu.memory_space<vmem>>, %arg4: memref<1x400xf32, #tpu.memory_space<vmem>>, %arg5: memref<1x400xf32, #tpu.memory_space<vmem>>, %arg6: memref<1x400xf32, #tpu.memory_space<vmem>>, %arg7: memref<400x300xbf16, #tpu.memory_space<vmem>>, %arg8: memref<8x300xbf16, #tpu.memory_space<vmem>>, %arg9: memref<1x300xf32, #tpu.memory_space<vmem>>, %arg10: memref<1x300xf32, #tpu.memory_space<vmem>>, %arg11: memref<1x300xf32, #tpu.memory_space<vmem>>, %arg12: memref<1x300xf32, #tpu.memory_space<vmem>>, %arg13: memref<1x1xf32, #tpu.memory_space<vmem>>, %arg14: memref<8x1xf32, #tpu.memory_space<vmem>>) attributes {dimension_semantics = [#tpu.dimension_semantics<parallel>], iteration_bounds = array<i64: 1>, scalar_prefetch = 0 : i64, scratch_operands = 0 : i64, tpu.core_type = #tpu.core_type<tc>, window_params = [{transform_indices = @transform_0, window_bounds = array<i64: 8, 16>}, {transform_indices = @transform_1, window_bounds = array<i64: 8, 8>}, {pipeline_mode = #tpu.pipeline_mode<synchronous>, transform_indices = @transform_2, window_bounds = array<i64: 16, 400>}, {pipeline_mode = #tpu.pipeline_mode<synchronous>, transform_indices = @transform_3, window_bounds = array<i64: 1, 400>}, {pipeline_mode = #tpu.pipeline_mode<synchronous>, transform_indices = @transform_4, window_bounds = array<i64: 1, 400>}, {pipeline_mode = #tpu.pipeline_mode<synchronous>, transform_indices = @transform_5, window_bounds = array<i64: 1, 400>}, {pipeline_mode = #tpu.pipeline_mode<synchronous>, transform_indices = @transform_6, window_bounds = array<i64: 400, 300>}, {pipeline_mode = #tpu.pipeline_mode<synchronous>, transform_indices = @transform_7, window_bounds = array<i64: 8, 300>}, {pipeline_mode = #tpu.pipeline_mode<synchronous>, transform_indices = @transform_8, window_bounds = array<i64: 1, 300>}, {pipeline_mode = #tpu.pipeline_mode<synchronous>, transform_indices = @transform_9, window_bounds = array<i64: 1, 300>}, {pipeline_mode = #tpu.pipeline_mode<synchronous>, transform_indices = @transform_10, window_bounds = array<i64: 1, 300>}, {pipeline_mode = #tpu.pipeline_mode<synchronous>, transform_indices = @transform_11, window_bounds = array<i64: 1, 300>}, {pipeline_mode = #tpu.pipeline_mode<synchronous>, transform_indices = @transform_12, window_bounds = array<i64: 1, 1>}, {transform_indices = @transform_13, window_bounds = array<i64: 8, 1>}]} {
    %c0 = arith.constant 0 : index
    %c0_0 = arith.constant 0 : index
    %0 = vector.load %arg3[%c0, %c0_0] : memref<16x400xbf16, #tpu.memory_space<vmem>>, vector<16x400xbf16>
    %c0_1 = arith.constant 0 : index
    %c0_2 = arith.constant 0 : index
    %1 = vector.load %arg4[%c0_1, %c0_2] : memref<1x400xf32, #tpu.memory_space<vmem>>, vector<1x400xf32>
    %c0_3 = arith.constant 0 : index
    %c0_4 = arith.constant 0 : index
    %2 = vector.load %arg5[%c0_3, %c0_4] : memref<1x400xf32, #tpu.memory_space<vmem>>, vector<1x400xf32>
    %c0_5 = arith.constant 0 : index
    %c0_6 = arith.constant 0 : index
    %3 = vector.load %arg6[%c0_5, %c0_6] : memref<1x400xf32, #tpu.memory_space<vmem>>, vector<1x400xf32>
    %c0_7 = arith.constant 0 : index
    %c0_8 = arith.constant 0 : index
    %4 = vector.load %arg7[%c0_7, %c0_8] : memref<400x300xbf16, #tpu.memory_space<vmem>>, vector<400x300xbf16>
    %c0_9 = arith.constant 0 : index
    %c0_10 = arith.constant 0 : index
    %5 = vector.load %arg8[%c0_9, %c0_10] : memref<8x300xbf16, #tpu.memory_space<vmem>>, vector<8x300xbf16>
    %c0_11 = arith.constant 0 : index
    %c0_12 = arith.constant 0 : index
    %6 = vector.load %arg9[%c0_11, %c0_12] : memref<1x300xf32, #tpu.memory_space<vmem>>, vector<1x300xf32>
    %c0_13 = arith.constant 0 : index
    %c0_14 = arith.constant 0 : index
    %7 = vector.load %arg10[%c0_13, %c0_14] : memref<1x300xf32, #tpu.memory_space<vmem>>, vector<1x300xf32>
    %c0_15 = arith.constant 0 : index
    %c0_16 = arith.constant 0 : index
    %8 = vector.load %arg11[%c0_15, %c0_16] : memref<1x300xf32, #tpu.memory_space<vmem>>, vector<1x300xf32>
    %c0_17 = arith.constant 0 : index
    %c0_18 = arith.constant 0 : index
    %9 = vector.load %arg12[%c0_17, %c0_18] : memref<1x300xf32, #tpu.memory_space<vmem>>, vector<1x300xf32>
    %c0_19 = arith.constant 0 : index
    %c0_20 = arith.constant 0 : index
    %10 = vector.load %arg13[%c0_19, %c0_20] : memref<1x1xf32, #tpu.memory_space<vmem>>, vector<1x1xf32>
    %c0_21 = arith.constant 0 : index
    %c0_22 = arith.constant 0 : index
    %11 = vector.load %arg1[%c0_21, %c0_22] : memref<8x16xf32, #tpu.memory_space<vmem>>, vector<8x16xf32>
    %12 = arith.truncf %11 : vector<8x16xf32> to vector<8x16xbf16>
    %c0_23 = arith.constant 0 : index
    %c0_24 = arith.constant 0 : index
    %13 = vector.load %arg2[%c0_23, %c0_24] : memref<8x8xf32, #tpu.memory_space<vmem>>, vector<8x8xf32>
    %14 = arith.truncf %13 : vector<8x8xf32> to vector<8x8xbf16>
    %cst = arith.constant dense<0.000000e+00> : vector<8x400xf32>
    %15 = tpu.matmul %12, %0, %cst {dimension_numbers = #tpu.dot_dimension_numbers<[1], [0], [0], [1], [0, 0, 1, 1], [], []>} : vector<8x16xbf16>, vector<16x400xbf16>, vector<8x400xf32> -> vector<8x400xf32>
    %16 = vector.broadcast %1 : vector<1x400xf32> to vector<8x400xf32>
    %17 = arith.addf %15, %16 : vector<8x400xf32>
    %cst_25 = arith.constant dense<0.000000e+00> : vector<8xf32>
    %18 = vector.multi_reduction <add>, %17, %cst_25 [1] : vector<8x400xf32> to vector<8xf32>
    %19 = vector.shape_cast %18 : vector<8xf32> to vector<8x1xf32>
    %cst_26 = arith.constant 4.000000e+02 : f32
    %20 = vector.broadcast %cst_26 : f32 to vector<8x1xf32>
    %21 = arith.divf %19, %20 : vector<8x1xf32>
    %22 = vector.broadcast %21 : vector<8x1xf32> to vector<8x400xf32>
    %23 = arith.subf %17, %22 : vector<8x400xf32>
    %24 = arith.mulf %23, %23 : vector<8x400xf32>
    %cst_27 = arith.constant dense<0.000000e+00> : vector<8xf32>
    %25 = vector.multi_reduction <add>, %24, %cst_27 [1] : vector<8x400xf32> to vector<8xf32>
    %26 = vector.shape_cast %25 : vector<8xf32> to vector<8x1xf32>
    %cst_28 = arith.constant 4.000000e+02 : f32
    %27 = vector.broadcast %cst_28 : f32 to vector<8x1xf32>
    %28 = arith.divf %26, %27 : vector<8x1xf32>
    %cst_29 = arith.constant 9.99999974E-6 : f32
    %29 = vector.broadcast %cst_29 : f32 to vector<8x1xf32>
    %30 = arith.addf %28, %29 : vector<8x1xf32>
    %31 = math.rsqrt %30 : vector<8x1xf32>
    %32 = vector.broadcast %31 : vector<8x1xf32> to vector<8x400xf32>
    %33 = arith.mulf %23, %32 : vector<8x400xf32>
    %34 = vector.broadcast %2 : vector<1x400xf32> to vector<8x400xf32>
    %35 = arith.mulf %33, %34 : vector<8x400xf32>
    %36 = vector.broadcast %3 : vector<1x400xf32> to vector<8x400xf32>
    %37 = arith.addf %35, %36 : vector<8x400xf32>
    %cst_30 = arith.constant 0.000000e+00 : f32
    %38 = vector.broadcast %cst_30 : f32 to vector<8x400xf32>
    %39 = arith.maximumf %37, %38 : vector<8x400xf32>
    %40 = arith.truncf %39 : vector<8x400xf32> to vector<8x400xbf16>
    %cst_31 = arith.constant dense<0.000000e+00> : vector<8x300xf32>
    %41 = tpu.matmul %40, %4, %cst_31 {dimension_numbers = #tpu.dot_dimension_numbers<[1], [0], [0], [1], [0, 0, 1, 1], [], []>} : vector<8x400xbf16>, vector<400x300xbf16>, vector<8x300xf32> -> vector<8x300xf32>
    %cst_32 = arith.constant dense<0.000000e+00> : vector<8x300xf32>
    %42 = tpu.matmul %14, %5, %cst_32 {dimension_numbers = #tpu.dot_dimension_numbers<[1], [0], [0], [1], [0, 0, 1, 1], [], []>} : vector<8x8xbf16>, vector<8x300xbf16>, vector<8x300xf32> -> vector<8x300xf32>
    %43 = arith.addf %41, %42 : vector<8x300xf32>
    %44 = vector.broadcast %6 : vector<1x300xf32> to vector<8x300xf32>
    %45 = arith.addf %43, %44 : vector<8x300xf32>
    %cst_33 = arith.constant dense<0.000000e+00> : vector<8xf32>
    %46 = vector.multi_reduction <add>, %45, %cst_33 [1] : vector<8x300xf32> to vector<8xf32>
    %47 = vector.shape_cast %46 : vector<8xf32> to vector<8x1xf32>
    %cst_34 = arith.constant 3.000000e+02 : f32
    %48 = vector.broadcast %cst_34 : f32 to vector<8x1xf32>
    %49 = arith.divf %47, %48 : vector<8x1xf32>
    %50 = vector.broadcast %49 : vector<8x1xf32> to vector<8x300xf32>
    %51 = arith.subf %45, %50 : vector<8x300xf32>
    %52 = arith.mulf %51, %51 : vector<8x300xf32>
    %cst_35 = arith.constant dense<0.000000e+00> : vector<8xf32>
    %53 = vector.multi_reduction <add>, %52, %cst_35 [1] : vector<8x300xf32> to vector<8xf32>
    %54 = vector.shape_cast %53 : vector<8xf32> to vector<8x1xf32>
    %cst_36 = arith.constant 3.000000e+02 : f32
    %55 = vector.broadcast %cst_36 : f32 to vector<8x1xf32>
    %56 = arith.divf %54, %55 : vector<8x1xf32>
    %cst_37 = arith.constant 9.99999974E-6 : f32
    %57 = vector.broadcast %cst_37 : f32 to vector<8x1xf32>
    %58 = arith.addf %56, %57 : vector<8x1xf32>
    %59 = math.rsqrt %58 : vector<8x1xf32>
    %60 = vector.broadcast %59 : vector<8x1xf32> to vector<8x300xf32>
    %61 = arith.mulf %51, %60 : vector<8x300xf32>
    %62 = vector.broadcast %7 : vector<1x300xf32> to vector<8x300xf32>
    %63 = arith.mulf %61, %62 : vector<8x300xf32>
    %64 = vector.broadcast %8 : vector<1x300xf32> to vector<8x300xf32>
    %65 = arith.addf %63, %64 : vector<8x300xf32>
    %cst_38 = arith.constant 0.000000e+00 : f32
    %66 = vector.broadcast %cst_38 : f32 to vector<8x300xf32>
    %67 = arith.maximumf %65, %66 : vector<8x300xf32>
    %68 = vector.broadcast %9 : vector<1x300xf32> to vector<8x300xf32>
    %69 = arith.mulf %67, %68 : vector<8x300xf32>
    %cst_39 = arith.constant dense<0.000000e+00> : vector<8xf32>
    %70 = vector.multi_reduction <add>, %69, %cst_39 [1] : vector<8x300xf32> to vector<8xf32>
    %71 = vector.shape_cast %70 : vector<8xf32> to vector<8x1xf32>
    %72 = vector.broadcast %10 : vector<1x1xf32> to vector<8x1xf32>
    %73 = arith.addf %71, %72 : vector<8x1xf32>
    %c0_40 = arith.constant 0 : index
    %c0_41 = arith.constant 0 : index
    %74 = vector.load %arg14[%c0_40, %c0_41] : memref<8x1xf32, #tpu.memory_space<vmem>>, vector<8x1xf32>
    tpu.vector_store %arg14[%c0_40, %c0_41], %73 {strides = array<i32>} : memref<8x1xf32, #tpu.memory_space<vmem>>, vector<8x1xf32>,
    return
  }
  func.func @transform_0(%arg0: i32) -> (i32, i32) {
    %c0_i32 = arith.constant 0 : i32
    %c0_i32_0 = arith.constant 0 : i32
    return %arg0, %c0_i32 : i32, i32
  }
  func.func @transform_1(%arg0: i32) -> (i32, i32) {
    %c0_i32 = arith.constant 0 : i32
    %c0_i32_0 = arith.constant 0 : i32
    return %arg0, %c0_i32 : i32, i32
  }
  func.func @transform_2(%arg0: i32) -> (i32, i32) {
    %c0_i32 = arith.constant 0 : i32
    %c0_i32_0 = arith.constant 0 : i32
    %c0_i32_1 = arith.constant 0 : i32
    return %c0_i32, %c0_i32_0 : i32, i32
  }
  func.func @transform_3(%arg0: i32) -> (i32, i32) {
    %c0_i32 = arith.constant 0 : i32
    %c0_i32_0 = arith.constant 0 : i32
    %c0_i32_1 = arith.constant 0 : i32
    return %c0_i32, %c0_i32_0 : i32, i32
  }
  func.func @transform_4(%arg0: i32) -> (i32, i32) {
    %c0_i32 = arith.constant 0 : i32
    %c0_i32_0 = arith.constant 0 : i32
    %c0_i32_1 = arith.constant 0 : i32
    return %c0_i32, %c0_i32_0 : i32, i32
  }
  func.func @transform_5(%arg0: i32) -> (i32, i32) {
    %c0_i32 = arith.constant 0 : i32
    %c0_i32_0 = arith.constant 0 : i32
    %c0_i32_1 = arith.constant 0 : i32
    return %c0_i32, %c0_i32_0 : i32, i32
  }
  func.func @transform_6(%arg0: i32) -> (i32, i32) {
    %c0_i32 = arith.constant 0 : i32
    %c0_i32_0 = arith.constant 0 : i32
    %c0_i32_1 = arith.constant 0 : i32
    return %c0_i32, %c0_i32_0 : i32, i32
  }
  func.func @transform_7(%arg0: i32) -> (i32, i32) {
    %c0_i32 = arith.constant 0 : i32
    %c0_i32_0 = arith.constant 0 : i32
    %c0_i32_1 = arith.constant 0 : i32
    return %c0_i32, %c0_i32_0 : i32, i32
  }
  func.func @transform_8(%arg0: i32) -> (i32, i32) {
    %c0_i32 = arith.constant 0 : i32
    %c0_i32_0 = arith.constant 0 : i32
    %c0_i32_1 = arith.constant 0 : i32
    return %c0_i32, %c0_i32_0 : i32, i32
  }
  func.func @transform_9(%arg0: i32) -> (i32, i32) {
    %c0_i32 = arith.constant 0 : i32
    %c0_i32_0 = arith.constant 0 : i32
    %c0_i32_1 = arith.constant 0 : i32
    return %c0_i32, %c0_i32_0 : i32, i32
  }
  func.func @transform_10(%arg0: i32) -> (i32, i32) {
    %c0_i32 = arith.constant 0 : i32
    %c0_i32_0 = arith.constant 0 : i32
    %c0_i32_1 = arith.constant 0 : i32
    return %c0_i32, %c0_i32_0 : i32, i32
  }
  func.func @transform_11(%arg0: i32) -> (i32, i32) {
    %c0_i32 = arith.constant 0 : i32
    %c0_i32_0 = arith.constant 0 : i32
    %c0_i32_1 = arith.constant 0 : i32
    return %c0_i32, %c0_i32_0 : i32, i32
  }
  func.func @transform_12(%arg0: i32) -> (i32, i32) {
    %c0_i32 = arith.constant 0 : i32
    %c0_i32_0 = arith.constant 0 : i32
    %c0_i32_1 = arith.constant 0 : i32
    return %c0_i32, %c0_i32_0 : i32, i32
  }
  func.func @transform_13(%arg0: i32) -> (i32, i32) {
    %c0_i32 = arith.constant 0 : i32
    %c0_i32_0 = arith.constant 0 : i32
    return %arg0, %c0_i32 : i32, i32
  }
}

</mosaic_0001>

<bundles_post_ra>
// kernel: tpu_custom_call.1
= control target key start
LH: loop header
LB: loop body
LE: loop exit
PB: predicated region body
PF: predicated region fallthrough
CT: control target
= control target key end

     0   :  { %s1881_s0 = inlined_call_operand.hbm [shape: f32[8,16], index: 0, kind: input, shape index: {}]   ;;  %s1882_s1 = inlined_call_operand.hbm [shape: f32[8,8], index: 1, kind: input, shape index: {}]   ;;  %s1883_s2 = inlined_call_operand.hbm [shape: bf16[16,400], index: 2, kind: input, shape index: {}]   ;;  %s1884_s3 = inlined_call_operand.vmem [shape: f32[1,400], index: 3, kind: input, shape index: {}]   ;;  %s1885_s4 = inlined_call_operand.vmem [shape: f32[1,400], index: 4, kind: input, shape index: {}]   ;;  %s1886_s5 = inlined_call_operand.hbm [shape: f32[1,400], index: 5, kind: input, shape index: {}]   ;;  %s1887_s6 = inlined_call_operand.hbm [shape: bf16[400,300], index: 6, kind: input, shape index: {}]   ;;  %s1888_s7 = inlined_call_operand.vmem [shape: bf16[8,300], index: 7, kind: input, shape index: {}]   ;;  %s1889_s8 = inlined_call_operand.vmem [shape: f32[1,300], index: 8, kind: input, shape index: {}]   ;;  %s1890_s9 = inlined_call_operand.vmem [shape: f32[1,300], index: 9, kind: input, shape index: {}]   ;;  %s1891_s10 = inlined_call_operand.vmem [shape: f32[1,300], index: 10, kind: input, shape index: {}]   ;;  %s1892_s11 = inlined_call_operand.vmem [shape: f32[1,300], index: 11, kind: input, shape index: {}]   ;;  %s1893_s12 = inlined_call_operand.<no memory space> [shape: f32[1,1], index: 12, kind: input, shape index: {}]   ;;  %s1894_s13 = inlined_call_operand.vmem [shape: f32[8,1], index: 13, kind: output, shape index: {}]  }
   0x1   :  { %v18_v0 = vstv %s1893_s12 }
   0x2   :  { %19 = vst [vmem:[#allocation2] sm:$0x1] %v18_v0 }
   0x3   :  { %20 = vsyncpa [#allocation4], 0 }
   0x4   :  { %21 = vsyncpa [#allocation6], 0 }
   0x5   :  { %22 = vsyncpa [#allocation9], 0  ;;  %s1595_s27 = smov [#allocation5]   ;;  %s1596_s29 = smov [#allocation8]  }
   0x6   :  { %s39_s28 = sshll.u32 %s1595_s27, 4  ;;  %s65_s30 = sshll.u32 %s1596_s29, 4  ;;  %s40_s28 = int_to_ptr.vmem [resolvable:$true] %s39_s28  ;;  %s66_s30 = int_to_ptr.vmem [resolvable:$true] %s65_s30 }
   0x7   :  { %s1479_s16 = scalar_lea.hbm %s1882_s1, 128 }
   0x8   :  { %p1480_p0 = scmp.ne.s32.totalorder %s1882_s1, %s1479_s16  ;;  %p1483_p1 = scmp.lt.u32.totalorder %s1479_s16, %s1882_s1 }
   0xa   :  { %p1485_p2 = pnand %p1483_p1, %p1480_p0 }
   0xc   :  { %1488 = shalt.err (!%p1485_p2)
}
   0xd   :  { %s1489_s20 = scalar_lea.vmem %s40_s28, 128  ;;  %p1494_p4 = scmp.lt.s32.totalorder %s40_s28, %s40_s28 }
   0xe   :  { %p1490_p3 = scmp.ne.s32.totalorder %s40_s28, %s1489_s20  ;;  %p1495_p5 = scmp.lt.s32.totalorder %s1489_s20, %s1489_s20 }
  0x10   :  { %p1496_p6 = por %p1495_p5, %p1494_p4 }
  0x12   :  { %p1497_p7 = pnand %p1496_p6, %p1490_p3 }
  0x14   :  { %1500 = shalt.err (!%p1497_p7)
}
  0x15   :  { %42 = dma.hbm_to_vmem [thread:$0]  %s1882_s1, 128, %s40_s28, [#allocation6]  }
  0x16   :  { %s1501_s25 = scalar_lea.hbm %s1886_s5, 64 }
  0x17   :  { %p1502_p8 = scmp.ne.s32.totalorder %s1886_s5, %s1501_s25  ;;  %p1505_p9 = scmp.lt.u32.totalorder %s1501_s25, %s1886_s5 }
  0x19   :  { %p1507_p10 = pnand %p1505_p9, %p1502_p8 }
  0x1b   :  { %1510 = shalt.err (!%p1507_p10)
}
  0x1c   :  { %s1511_s15 = scalar_lea.vmem %s66_s30, 64  ;;  %p1516_p12 = scmp.lt.s32.totalorder %s66_s30, %s66_s30 }
  0x1d   :  { %p1512_p11 = scmp.ne.s32.totalorder %s66_s30, %s1511_s15  ;;  %p1517_p13 = scmp.lt.s32.totalorder %s1511_s15, %s1511_s15 }
  0x1f   :  { %p1518_p0 = por %p1517_p13, %p1516_p12 }
  0x21   :  { %p1519_p1 = pnand %p1518_p0, %p1512_p11 }
  0x23   :  { %1522 = shalt.err (!%p1519_p1)
}
  0x24   :  { %68 = dma.hbm_to_vmem [thread:$0]  %s1886_s5, 64, %s66_s30, [#allocation9]  }
  0x25   :  { %s1597_s16 = smov [#allocation3]   ;;  %s1598_s18 = smov [#allocation7]  }
  0x26   :  { %s29_s17 = sshll.u32 %s1597_s16, 4  ;;  %s48_s19 = sshll.u32 %s1598_s18, 4  ;;  %s30_s17 = int_to_ptr.vmem [resolvable:$true] %s29_s17  ;;  %s1704_s19 = int_to_ptr.vmem [resolvable:$true] %s48_s19 }
  0x27   :  { %s1523_s21 = scalar_lea.hbm %s1881_s0, 128 }
  0x28   :  { %p1524_p2 = scmp.ne.s32.totalorder %s1881_s0, %s1523_s21  ;;  %p1527_p3 = scmp.lt.u32.totalorder %s1523_s21, %s1881_s0 }
  0x2a   :  { %p1529_p4 = pnand %p1527_p3, %p1524_p2 }
  0x2c   :  { %1532 = shalt.err (!%p1529_p4)
}
  0x2d   :  { %s1533_s5 = scalar_lea.vmem %s30_s17, 128  ;;  %p1538_p6 = scmp.lt.s32.totalorder %s30_s17, %s30_s17 }
  0x2e   :  { %p1534_p5 = scmp.ne.s32.totalorder %s30_s17, %s1533_s5  ;;  %p1539_p7 = scmp.lt.s32.totalorder %s1533_s5, %s1533_s5 }
  0x30   :  { %p1540_p8 = por %p1539_p7, %p1538_p6 }
  0x32   :  { %p1541_p9 = pnand %p1540_p8, %p1534_p5 }
  0x34   :  { %1544 = shalt.err (!%p1541_p9)
}
  0x35   :  { %32 = dma.hbm_to_vmem [thread:$0]  %s1881_s0, 128, %s30_s17, [#allocation4]  }
  0x36   :  { %s1545_s14 = scalar_lea.hbm %s1883_s2, 512 }
  0x37   :  { %p1546_p10 = scmp.ne.s32.totalorder %s1883_s2, %s1545_s14  ;;  %p1549_p11 = scmp.lt.u32.totalorder %s1545_s14, %s1883_s2 }
  0x39   :  { %p1551_p12 = pnand %p1549_p11, %p1546_p10 }
  0x3b   :  { %1554 = shalt.err (!%p1551_p12)
}
  0x3c   :  { %s1555_s18 = scalar_lea.vmem %s1704_s19, 512  ;;  %p1560_p0 = scmp.lt.s32.totalorder %s1704_s19, %s1704_s19 }
  0x3d   :  { %p1556_p13 = scmp.ne.s32.totalorder %s1704_s19, %s1555_s18  ;;  %p1561_p1 = scmp.lt.s32.totalorder %s1555_s18, %s1555_s18 }
  0x3f   :  { %p1562_p2 = por %p1561_p1, %p1560_p0 }
  0x41   :  { %p1563_p3 = pnand %p1562_p2, %p1556_p13 }
  0x43   :  { %1566 = shalt.err (!%p1563_p3)
}
  0x44   :  { %s1599_s0 = smov 256   ;;  %s1600_s17 = smov 16  }
  0x45   :  { %54 = dma.hbm_to_vmem [thread:$0]  %s1883_s2, 512, %s1704_s19, [#allocation6], %s1599_s0, %s1599_s0, %s1600_s17  }
  0x46   :  { %s1601_s21 = smov [#allocation10]   ;;  %s1567_s25 = scalar_lea.hbm %s1887_s6, 9600 }
  0x47   :  { %s74_s22 = sshll.u32 %s1601_s21, 4  ;;  %p1568_p4 = scmp.ne.s32.totalorder %s1887_s6, %s1567_s25  ;;  %s75_s22 = int_to_ptr.vmem [resolvable:$true] %s74_s22 }
  0x48   :  { %p1571_p5 = scmp.lt.u32.totalorder %s1567_s25, %s1887_s6 }
  0x4a   :  { %p1573_p6 = pnand %p1571_p5, %p1568_p4 }
  0x4c   :  { %1576 = shalt.err (!%p1573_p6)
}
  0x4d   :  { %s1577_s29 = scalar_lea.vmem %s75_s22, 9600  ;;  %p1582_p8 = scmp.lt.s32.totalorder %s75_s22, %s75_s22 }
  0x4e   :  { %p1578_p7 = scmp.ne.s32.totalorder %s75_s22, %s1577_s29  ;;  %p1583_p9 = scmp.lt.s32.totalorder %s1577_s29, %s1577_s29 }
  0x50   :  { %p1584_p10 = por %p1583_p9, %p1582_p8 }
  0x52   :  { %p1585_p11 = pnand %p1584_p10, %p1578_p7 }
  0x54   :  { %1588 = shalt.err (!%p1585_p11)
}
  0x55   :  { %s1602_s2 = smov 192   ;;  %s1603_s19 = smov 12  }
  0x56   :  { %80 = dma.hbm_to_vmem [thread:$0]  %s1887_s6, 9600, %s75_s22, [#allocation9], %s1602_s2, %s1602_s2, %s1603_s19  }
  0x57   :  { %1589 = dma.done.wait [#allocation4], 128  }
  0x58   :  { %1590 = vsyncadd [#allocation4], 4294967168 }
  0x59   :  { %1591 = dma.done.wait [#allocation6], 640  }
  0x5a   :  { %1592 = vsyncadd [#allocation6], 4294966656 }
  0x5b   :  { %1593 = dma.done.wait [#allocation9], 9664  }
  0x5c   :  { %1594 = vsyncadd [#allocation9], 4294957632  ;;  %v1604_v1 = vmov 0   ;;  %v1366_v2 = vld [vmem:[#allocation7 + $0x4] ss:$16 sps:$4 sm:$0xff]   ;;  %vm268_vm0 = vcmask 130048   ;;  %v228_v8 = vlaneseq }
  0x5d   :  { %304 = vmatprep.mubr.bf16.mxu1 %v1604_v1  ;;  %v1368_v3 = vld [vmem:[#allocation7] ss:$16 sps:$4 sm:$0xff]   ;;  %272 = vmatprep.subr.bf16.mxu1 %v1366_v2  ;;  %v1371_v6 = vld [vmem:[#allocation7 + $0xc] ss:$16 sps:$4 sm:$0xff]   ;;  %v1369_v7 = vld [vmem:[#allocation7 + $0x8] ss:$16 sps:$4 sm:$0xff]  }
  0x5e   :  { %v223_v4 = vld [vmem:[#allocation3] sm:$0xff]  ;;  %273 = vmatpush1.bf16.msra.mxu1 %v1368_v3  ;;  %v229_v9 = vshrl.u32 %v228_v8, 7  ;;  %v1375_v37 = vld [vmem:[#allocation10 + $0x1c] ss:$12 sps:$4 sm:$0xff]   ;;  %vm453_vm1 = vcmask 1043456   ;;  %v225_v42 = vld [vmem:[#allocation5] sm:$0xff] }
  0x5f   :  { %v224_v5 = vpack.c.bf16 %v223_v4, %v223_v4  ;;  %313 = vmatprep.subr.bf16.mxu1 %v1371_v6  ;;  %v113_v12 = vld [vmem:[%s1884_s3] sm:$0xf]  ;;  %v1372_v35 = vld [vmem:[#allocation10 + $0x4] ss:$12 sps:$4 sm:$0xff]   ;;  %v1378_v43 = vld [vmem:[#allocation10 + $0x34] ss:$12 sps:$4 sm:$0xff]   ;;  %v226_v45 = vpack.c.bf16 %v225_v42, %v225_v42 }
  0x60   :  { %v1752_v10 = vsub.s32 0, %v229_v9  ;;  %v1754_v11 = vsub.s32 1, %v229_v9  ;;  %v1761_v17 = vsub.s32 2, %v229_v9  ;;  %v1763_v19 = vsub.s32 3, %v229_v9  ;;  %v1374_v36 = vld [vmem:[#allocation10] ss:$12 sps:$4 sm:$0xff]   ;;  %947 = vmatprep.subr.bf16.mxu0 %v1372_v35 }
  0x61   :  { %1238 = vmatmul.mubr.msk.bf16.vlgmr.msra.gmra.mrb[0].mxu1 %vm268_vm0, %v224_v5  ;;  %v216_v38 = vld [vmem:[%s1888_s7] sm:$0xff]  ;;  %948 = vmatpush1.bf16.msra.mxu0 %v1374_v36  ;;  %v1377_v39 = vld [vmem:[#allocation10 + $0x18] ss:$12 sps:$4 sm:$0xff]   ;;  %v1392_v46 = vld [vmem:[%s1888_s7 + $0x8] ss:$0 sps:$4 sm:$0xff]   ;;  %vm449_vm2 = vcmask 64512  }
  0x62   :  { %314 = vmatpush1.bf16.msra.mxu1 %v1369_v7  ;;  %345 = vmatprep.mubr.bf16.mxu1 %v1604_v1  ;;  %v231_v14 = vrot.slane %v113_v12, %v1752_v10  ;;  %v235_v15 = vrot.slane %v113_v12, %v1754_v11  ;;  %v239_v23 = vrot.slane %v113_v12, %v1761_v17  ;;  %v1380_v47 = vld [vmem:[#allocation10 + $0x30] ss:$12 sps:$4 sm:$0xff]   ;;  %v1605_v48 = vmov 0.0   ;;  %v1381_v51 = vld [vmem:[#allocation10 + $0x4c] ss:$12 sps:$4 sm:$0xff]  }
  0x63   :  { %v243_v24 = vrot.slane %v113_v12, %v1763_v19  ;;  %v1241_v40 = vcombine.high %v216_v38, %v216_v38  ;;  %v1240_v41 = vcombine.low %v216_v38, %v216_v38  ;;  %949 = vmatprep.subr.bf16.mxu0 %v1375_v37  ;;  %v461_v49 = vsel %vm453_vm1, %v1392_v46, 0  ;;  %v1400_v50 = vld [vmem:[#allocation10 + $0x184] ss:$12 sps:$4 sm:$0xff]   ;;  %v1384_v52 = vld [vmem:[#allocation10 + $0x48] ss:$12 sps:$4 sm:$0xff]  }
  0x64   :  { %vm1606_vm3 = vmmov 0   ;;  %v1386_v53 = vld [vmem:[#allocation10 + $0x64] ss:$12 sps:$4 sm:$0xff]   ;;  %v1398_v54 = vld [vmem:[#allocation10 + $0x180] ss:$12 sps:$4 sm:$0xff]   ;;  %vm1129_vm4 = vcmask 359424  }
  0x65   :  { %1243 = vmatprep.subr.msk.bf16.mxu1 %vm453_vm1, %v1241_v40  ;;  %v455_v44 = vsel %vm453_vm1, %v1240_v41, 0  ;;  %950 = vmatpush1.bf16.msra.mxu0 %v1377_v39  ;;  %v1388_v55 = vld [vmem:[#allocation10 + $0x60] ss:$12 sps:$4 sm:$0xff]   ;;  %v1406_v56 = vld [vmem:[#allocation10 + $0x19c] ss:$12 sps:$4 sm:$0xff]   ;;  %vm1225_vm5 = vcmask 7168  }
  0x66   :  { %951 = vmatprep.subr.bf16.mxu0 %v1378_v43  ;;  %v1389_v57 = vld [vmem:[#allocation10 + $0x7c] ss:$12 sps:$4 sm:$0xff]   ;;  %v1404_v58 = vld [vmem:[#allocation10 + $0x198] ss:$12 sps:$4 sm:$0xff]   ;;  %v1412_v60 = vld [vmem:[#allocation10 + $0x1b4] ss:$12 sps:$4 sm:$0xff]  }
  0x67   :  { %v1391_v59 = vld [vmem:[#allocation10 + $0x78] ss:$12 sps:$4 sm:$0xff]   ;;  %v1393_v61 = vld [vmem:[#allocation10 + $0x94] ss:$12 sps:$4 sm:$0xff]   ;;  %v1410_v62 = vld [vmem:[#allocation10 + $0x1b0] ss:$12 sps:$4 sm:$0xff]  }
  0x68   :  { %v1395_v63 = vld [vmem:[#allocation10 + $0x90] ss:$12 sps:$4 sm:$0xff]   ;;  %v1396_v0 = vld [vmem:[#allocation10 + $0xac] ss:$12 sps:$4 sm:$0xff]   ;;  %v1401_v2 = vld [vmem:[#allocation10 + $0xa8] ss:$12 sps:$4 sm:$0xff]  }
  0x69   :  { %1239 = vmatmul.mubr.msk.bf16.vlgmr.msra.gmra.mrb[4].mxu1 %vm268_vm0, %v224_v5  ;;  %952 = vmatpush1.bf16.msra.mxu0 %v1380_v47  ;;  %v1402_v3 = vld [vmem:[#allocation10 + $0xc4] ss:$12 sps:$4 sm:$0xff]   ;;  %v1407_v4 = vld [vmem:[#allocation10 + $0xc0] ss:$12 sps:$4 sm:$0xff]   ;;  %v1408_v5 = vld [vmem:[#allocation10 + $0xdc] ss:$12 sps:$4 sm:$0xff]  }
  0x6a   :  { %495 = vmatprep.mubr.bf16.mxu1 %v1604_v1  ;;  %464 = vmatpush1.bf16.msra.mxu1 %v455_v44  ;;  %v1413_v6 = vld [vmem:[#allocation10 + $0xd8] ss:$12 sps:$4 sm:$0xff]   ;;  %v1431_v36 = vld [vmem:[#allocation10 + $0x120] ss:$12 sps:$4 sm:$0xff]   ;;  %v1432_v37 = vld [vmem:[#allocation10 + $0x13c] ss:$12 sps:$4 sm:$0xff]  }
  0x6b   :  { %1348 = vmatprep.subr.bf16.mxu1 %v1605_v48  ;;  %953 = vmatprep.subr.bf16.mxu0 %v1381_v51  ;;  %v1428_v35 = vld [vmem:[#allocation10 + $0x1f8] ss:$12 sps:$4 sm:$0xff]   ;;  %v1436_v38 = vld [vmem:[#allocation10 + $0x214] ss:$12 sps:$4 sm:$0xff]   ;;  %v1434_v39 = vld [vmem:[#allocation10 + $0x210] ss:$12 sps:$4 sm:$0xff]  }
  0x6c   :  { %v1437_v40 = vld [vmem:[#allocation10 + $0x138] ss:$12 sps:$4 sm:$0xff]   ;;  %v1438_v41 = vld [vmem:[#allocation10 + $0x154] ss:$12 sps:$4 sm:$0xff]   ;;  %v1443_v44 = vld [vmem:[#allocation10 + $0x150] ss:$12 sps:$4 sm:$0xff]  }
  0x6d   :  { %954 = vmatpush1.bf16.msra.mxu0 %v1384_v52  ;;  %v1442_v42 = vld [vmem:[#allocation10 + $0x22c] ss:$12 sps:$4 sm:$0xff]   ;;  %v1440_v43 = vld [vmem:[#allocation10 + $0x228] ss:$12 sps:$4 sm:$0xff]   ;;  %v1448_v46 = vld [vmem:[#allocation10 + $0x244] ss:$12 sps:$4 sm:$0xff]  }
  0x6e   :  { %955 = vmatprep.subr.bf16.mxu0 %v1386_v53  ;;  %v1446_v47 = vld [vmem:[#allocation10 + $0x240] ss:$12 sps:$4 sm:$0xff]  }
  0x71   :  { %1244 = vmatmul.mubr.msk.bf16.vlgmr.msra.gmra.mrb[8].mxu1 %vm449_vm2, %v226_v45  ;;  %956 = vmatpush1.bf16.msra.mxu0 %v1388_v55 }
  0x72   :  { %1349 = vmatpush3.bf16.msra.mxu1 %v461_v49  ;;  %1350 = vmatprep.mubr.msk.bf16.mxu1 %vm1606_vm3, %v1605_v48  ;;  %v1449_v48 = vld [vmem:[#allocation10 + $0x168] ss:$12 sps:$4 sm:$0xff]  }
  0x73   :  { %988 = vmatprep.subr.bf16.mxu1 %v1400_v50  ;;  %957 = vmatprep.subr.bf16.mxu0 %v1389_v57  ;;  %v1450_v49 = vld [vmem:[#allocation10 + $0xc8] ss:$12 sps:$4 sm:$0xff]  }
  0x75   :  { %958 = vmatpush1.bf16.msra.mxu0 %v1391_v59 }
  0x76   :  { %959 = vmatprep.subr.bf16.mxu0 %v1393_v61  ;;  %v114_v61 = vld [vmem:[%s1885_s4] sm:$0xf] }
  0x79   :  { %1351 = vmatmul.mubr.msk.bf16.vlgmr.msra.gmra.mrb[12].mxu1 %vm449_vm2, %v226_v45  ;;  %960 = vmatpush1.bf16.msra.mxu0 %v1395_v63  ;;  %v1444_v45 = vld [vmem:[#allocation10 + $0x16c] ss:$12 sps:$4 sm:$0xff]   ;;  %v391_v63 = vrot.slane %v114_v61, %v1754_v11 }
  0x7a   :  { %989 = vmatpush1.bf16.msra.mxu1 %v1398_v54  ;;  %961 = vmatprep.subr.bf16.mxu0 %v1396_v0  ;;  %v399_v0 = vrot.slane %v114_v61, %v1763_v19 }
  0x7b   :  { %990 = vmatprep.subr.bf16.mxu1 %v1406_v56 }
  0x7d   :  { %962 = vmatpush1.bf16.msra.mxu0 %v1401_v2  ;;  %v387_v2 = vrot.slane %v114_v61, %v1752_v10 }
  0x7e   :  { %991 = vmatpush1.bf16.msra.mxu1 %v1404_v58  ;;  %963 = vmatprep.subr.bf16.mxu0 %v1402_v3  ;;  %v395_v3 = vrot.slane %v114_v61, %v1761_v17 }
  0x7f   :  { %992 = vmatprep.subr.bf16.mxu1 %v1412_v60 }
  0x81   :  { %964 = vmatpush1.bf16.msra.mxu0 %v1407_v4 }
  0x82   :  { %993 = vmatpush1.bf16.msra.mxu1 %v1410_v62  ;;  %965 = vmatprep.subr.bf16.mxu0 %v1408_v5  ;;  %v115_v62 = vld [vmem:[#allocation8] sm:$0xf] }
  0x83   :  { %v416_v5 = vrot.slane %v115_v62, %v1754_v11 }
  0x85   :  { %966 = vmatpush1.bf16.msra.mxu0 %v1413_v6  ;;  %v424_v6 = vrot.slane %v115_v62, %v1763_v19 }
 0x134   :  { %v306_v13 = vpop.f32.mrb[0].mxu1 }
 0x135   :  { %v308_v16 = vpop.f32.mrb[1].mxu1  ;;  %v1765_v21 = vadd.f32 %v306_v13, %v231_v14 }
 0x136   :  { %v310_v18 = vpop.f32.mrb[2].mxu1  ;;  %v1767_v22 = vadd.f32 %v308_v16, %v235_v15 }
 0x137   :  { %v311_v20 = vpop.f32.mrb[3].mxu1 }
 0x138   :  { %v354_v26 = vadd.f32 %v1767_v22, %v1765_v21 }
 0x13c   :  { %v347_v25 = vpop.f32.mrb[4].mxu1 }
 0x13d   :  { %v1773_v27 = vadd.f32 %v347_v25, %v239_v23  ;;  %v349_v28 = vpop.f32.mrb[5].mxu1  ;;  %v1414_v25 = vld [vmem:[#allocation10 + $0xf4] ss:$12 sps:$4 sm:$0xff]  }
 0x13e   :  { %v1775_v29 = vadd.f32 %v349_v28, %v243_v24  ;;  %v351_v30 = vpop.f32.mrb[6].mxu1  ;;  %v1419_v28 = vld [vmem:[#allocation10 + $0xf0] ss:$12 sps:$4 sm:$0xff]   ;;  %967 = vmatprep.subr.bf16.mxu0 %v1414_v25 }
 0x13f   :  { %v352_v31 = vpop.f32.mrb[7].mxu1  ;;  %v355_v32 = vadd.f32 %v354_v26, %v1773_v27  ;;  %v1418_v26 = vld [vmem:[#allocation10 + $0x1cc] ss:$12 sps:$4 sm:$0xff]   ;;  %968 = vmatpush1.bf16.msra.mxu0 %v1419_v28  ;;  %v1424_v30 = vld [vmem:[#allocation10 + $0x1e4] ss:$12 sps:$4 sm:$0xff]  }
 0x140   :  { %v356_v33 = vsel %vm268_vm0, %v1775_v29, 0.0  ;;  %994 = vmatprep.subr.bf16.mxu1 %v1418_v26  ;;  %v1422_v31 = vld [vmem:[#allocation10 + $0x1e0] ss:$12 sps:$4 sm:$0xff]  }
 0x141   :  { %v357_v34 = vadd.f32 %v356_v33, %v355_v32  ;;  %v1425_v32 = vld [vmem:[#allocation10 + $0x108] ss:$12 sps:$4 sm:$0xff]   ;;  %v1426_v33 = vld [vmem:[#allocation10 + $0x124] ss:$12 sps:$4 sm:$0xff]  }
 0x143   :  { %358 = vadd.xlane.f32.xlu0 %v357_v34  ;;  %v1430_v34 = vld [vmem:[#allocation10 + $0x1fc] ss:$12 sps:$4 sm:$0xff]  }
 0x144   :  { %v1813_v50 = vpop.f32.mrb[8].mxu1 }
 0x145   :  { %v1815_v51 = vpop.f32.mrb[9].mxu1 }
 0x146   :  { %v501_v52 = vpop.f32.mrb[10].mxu1 }
 0x147   :  { %v502_v53 = vpop.f32.mrb[11].mxu1  ;;  %v1469_v52 = vld [vmem:[#allocation10 + $0x98] ss:$12 sps:$4 sm:$0xff]  }
 0x148   :  { %v1470_v53 = vld [vmem:[#allocation10 + $0x218] ss:$12 sps:$4 sm:$0xff]  }
 0x14c   :  { %v1817_v54 = vpop.f32.mrb[12].mxu1 }
 0x14d   :  { %v1352_v55 = vpop.f32.mrb[13].mxu1 }
 0x14e   :  { %v541_v56 = vpop.f32.mrb[14].mxu1  ;;  %v1471_v55 = vld [vmem:[#allocation10 + $0x170] ss:$12 sps:$4 sm:$0xff]  }
 0x14f   :  { %v1353_v57 = vpop.f32.mrb[15].mxu1  ;;  %v1472_v56 = vld [vmem:[#allocation10 + $0xb0] ss:$12 sps:$4 sm:$0xff]  }
 0x150   :  { %v1473_v57 = vld [vmem:[#allocation10 + $0x230] ss:$12 sps:$4 sm:$0xff]  }
 0x1d0   :  { %v359_v7 = vpop.xlane.xlu0 %358 }
 0x1d1   :  { %v361_v8 = vmul.f32 0.0025, %v359_v7  ;;  %v412_v7 = vrot.slane %v115_v62, %v1752_v10 }
 0x1d3   :  { %v1792_v9 = vsub.f32 %v1765_v21, %v361_v8  ;;  %v1795_v12 = vsub.f32 %v1767_v22, %v361_v8  ;;  %v1798_v13 = vsub.f32 %v1773_v27, %v361_v8  ;;  %v1801_v14 = vsub.f32 %v1775_v29, %v361_v8  ;;  %v1416_v27 = vld [vmem:[#allocation10 + $0x1c8] ss:$12 sps:$4 sm:$0xff]   ;;  %v1420_v29 = vld [vmem:[#allocation10 + $0x10c] ss:$12 sps:$4 sm:$0xff]  }
 0x1d4   :  { %995 = vmatpush1.bf16.msra.mxu1 %v1416_v27  ;;  %969 = vmatprep.subr.bf16.mxu0 %v1420_v29  ;;  %v420_v8 = vrot.slane %v115_v62, %v1761_v17 }
 0x1d5   :  { %v366_v15 = vmul.f32 %v1792_v9, %v1792_v9  ;;  %v367_v16 = vmul.f32 %v1795_v12, %v1795_v12  ;;  %v369_v18 = vmul.f32 %v1801_v14, %v1801_v14  ;;  %v368_v20 = vmul.f32 %v1798_v13, %v1798_v13  ;;  %996 = vmatprep.subr.bf16.mxu1 %v1424_v30 }
 0x1d6   :  { %970 = vmatpush1.bf16.msra.mxu0 %v1425_v32 }
 0x1d7   :  { %v370_v21 = vadd.f32 %v367_v16, %v366_v15  ;;  %v372_v23 = vsel %vm268_vm0, %v369_v18, 0.0  ;;  %971 = vmatprep.subr.bf16.mxu0 %v1426_v33 }
 0x1d8   :  { %997 = vmatpush1.bf16.msra.mxu1 %v1422_v31 }
 0x1d9   :  { %v371_v22 = vadd.f32 %v370_v21, %v368_v20  ;;  %998 = vmatprep.subr.bf16.mxu1 %v1430_v34  ;;  %v1452_v34 = vld [vmem:[#allocation10 + $0x188] ss:$12 sps:$4 sm:$0xff]  }
 0x1da   :  { %972 = vmatpush1.bf16.msra.mxu0 %v1431_v36  ;;  %v1455_v36 = vld [vmem:[#allocation10 + $0x1a0] ss:$12 sps:$4 sm:$0xff]  }
 0x1db   :  { %v373_v24 = vadd.f32 %v372_v23, %v371_v22  ;;  %973 = vmatprep.subr.bf16.mxu0 %v1432_v37  ;;  %v1456_v37 = vld [vmem:[#allocation10 + $0xf8] ss:$12 sps:$4 sm:$0xff]  }
 0x1dc   :  { %999 = vmatpush1.bf16.msra.mxu1 %v1428_v35  ;;  %v1454_v35 = vld [vmem:[#allocation10 + $0x20] ss:$12 sps:$4 sm:$0xff]  }
 0x1dd   :  { %374 = vadd.xlane.f32.xlu0 %v373_v24  ;;  %1000 = vmatprep.subr.bf16.mxu1 %v1436_v38  ;;  %v1457_v38 = vld [vmem:[#allocation10 + $0x38] ss:$12 sps:$4 sm:$0xff]  }
 0x1de   :  { %974 = vmatpush1.bf16.msra.mxu0 %v1437_v40  ;;  %v1459_v40 = vld [vmem:[#allocation10 + $0x110] ss:$12 sps:$4 sm:$0xff]  }
 0x1df   :  { %975 = vmatprep.subr.bf16.mxu0 %v1438_v41  ;;  %v1460_v41 = vld [vmem:[#allocation10 + $0x50] ss:$12 sps:$4 sm:$0xff]  }
 0x1e0   :  { %1001 = vmatpush1.bf16.msra.mxu1 %v1434_v39  ;;  %v1458_v39 = vld [vmem:[#allocation10 + $0x1b8] ss:$12 sps:$4 sm:$0xff]  }
 0x1e1   :  { %1002 = vmatprep.subr.bf16.mxu1 %v1442_v42  ;;  %v1461_v42 = vld [vmem:[#allocation10 + $0x1d0] ss:$12 sps:$4 sm:$0xff]  }
 0x1e2   :  { %976 = vmatpush1.bf16.msra.mxu0 %v1443_v44  ;;  %v1463_v44 = vld [vmem:[#allocation10 + $0x68] ss:$12 sps:$4 sm:$0xff]  }
 0x1e3   :  { %977 = vmatprep.subr.bf16.mxu0 %v1444_v45  ;;  %v1464_v45 = vld [vmem:[#allocation10 + $0x1e8] ss:$12 sps:$4 sm:$0xff]  }
 0x1e4   :  { %1003 = vmatpush1.bf16.msra.mxu1 %v1440_v43  ;;  %v1462_v43 = vld [vmem:[#allocation10 + $0x128] ss:$12 sps:$4 sm:$0xff]  }
 0x1e5   :  { %1004 = vmatprep.subr.bf16.mxu1 %v1448_v46  ;;  %v1465_v46 = vld [vmem:[#allocation10 + $0x140] ss:$12 sps:$4 sm:$0xff]  }
 0x1e6   :  { %978 = vmatpush1.bf16.msra.mxu0 %v1449_v48  ;;  %v1467_v48 = vld [vmem:[#allocation10 + $0x200] ss:$12 sps:$4 sm:$0xff]  }
 0x1e7   :  { %1069 = vmatprep.subr.bf16.mxu0 %v1604_v1 }
 0x1e8   :  { %1005 = vmatpush1.bf16.msra.mxu1 %v1446_v47  ;;  %v1466_v47 = vld [vmem:[#allocation10 + $0x80] ss:$12 sps:$4 sm:$0xff]  }
 0x1e9   :  { %1326 = vmatprep.subr.bf16.mxu1 %v1450_v49  ;;  %v1468_v49 = vld [vmem:[#allocation10 + $0x158] ss:$12 sps:$4 sm:$0xff]  }
 0x26a   :  { %v375_v58 = vpop.xlane.xlu0 %374 }
 0x26b   :  { %v376_v59 = vmul.f32 0.0025, %v375_v58  ;;  %v1474_v58 = vld [vmem:[#allocation10 + $0x248] ss:$12 sps:$4 sm:$0xff]  }
 0x26d   :  { %v377_v60 = vadd.f32 1e-05, %v376_v59 }
 0x26f   :  { %1475 = vrsqrt.f32 %v377_v60 }
 0x279   :  { %v1476_v4 = vpop.eup %1475 }
 0x27a   :  { %v380_v15 = vmul.f32 %v1476_v4, %v1795_v12  ;;  %v382_v16 = vmul.f32 %v1476_v4, %v1801_v14  ;;  %v379_v18 = vmul.f32 %v1476_v4, %v1792_v9  ;;  %v381_v20 = vmul.f32 %v1476_v4, %v1798_v13  ;;  %v1451_v9 = vld [vmem:[#allocation10 + $0x8] ss:$12 sps:$4 sm:$0xff]   ;;  %v1453_v13 = vld [vmem:[#allocation10 + $0xe0] ss:$12 sps:$4 sm:$0xff]  }
 0x27c   :  { %v405_v21 = vmul.f32 %v391_v63, %v380_v15  ;;  %v407_v22 = vmul.f32 %v399_v0, %v382_v16  ;;  %v404_v23 = vmul.f32 %v387_v2, %v379_v18  ;;  %v406_v24 = vmul.f32 %v395_v3, %v381_v20 }
 0x27e   :  { %v430_v25 = vadd.f32 %v416_v5, %v405_v21  ;;  %v432_v26 = vadd.f32 %v424_v6, %v407_v22  ;;  %v429_v27 = vadd.f32 %v412_v7, %v404_v23  ;;  %v431_v19 = vadd.f32 %v420_v8, %v406_v24 }
 0x280   :  { %v434_v28 = vmax.f32 %v430_v25, 0.0  ;;  %v436_v29 = vmax.f32 %v432_v26, 0.0  ;;  %v433_v30 = vmax.f32 %v429_v27, 0.0  ;;  %v435_v31 = vmax.f32 %v431_v19, 0.0 }
 0x282   :  { %v438_v32 = vpack.c.bf16 %v434_v28, %v434_v28  ;;  %v440_v12 = vpack.c.bf16 %v436_v29, %v436_v29  ;;  %v437_v33 = vpack.c.bf16 %v433_v30, %v433_v30  ;;  %v1834_v14 = vpack.c.bf16 %v435_v31, %v435_v31 }
 0x284   :  { %979 = vmatprep.mubr.bf16.mxu0 %v438_v32  ;;  %1321 = vmatprep.mubr.msk.bf16.mxu1 %vm268_vm0, %v440_v12 }
 0x285   :  { %980 = vmatmul.mubr.bf16.vlgmr.msra.gmra.mrb[0].mxu0 %v437_v33  ;;  %1021 = vmatmul.mubr.bf16.vlgmr.msra.gmra.mrb[16].mxu1 %v1834_v14 }
 0x286   :  { %1327 = vmatpush3.bf16.msra.mxu1 %v1451_v9  ;;  %1070 = vmatpush1.bf16.msra.mxu0 %v1452_v34 }
 0x287   :  { %1061 = vmatprep.mubr.bf16.mxu1 %v438_v32  ;;  %1322 = vmatprep.mubr.msk.bf16.mxu0 %vm268_vm0, %v440_v12 }
 0x288   :  { %1328 = vmatprep.subr.bf16.mxu1 %v1453_v13  ;;  %1071 = vmatprep.subr.bf16.mxu0 %v1604_v1 }
 0x28a   :  { %1329 = vmatpush3.bf16.msra.mxu1 %v1454_v35  ;;  %1072 = vmatpush1.bf16.msra.mxu0 %v1455_v36 }
 0x28b   :  { %1330 = vmatprep.subr.bf16.mxu1 %v1456_v37  ;;  %1073 = vmatprep.subr.bf16.mxu0 %v1604_v1 }
 0x28e   :  { %1331 = vmatpush3.bf16.msra.mxu1 %v1457_v38  ;;  %1074 = vmatpush1.bf16.msra.mxu0 %v1458_v39 }
 0x28f   :  { %1332 = vmatprep.subr.bf16.mxu1 %v1459_v40  ;;  %1075 = vmatprep.subr.bf16.mxu0 %v1604_v1 }
 0x292   :  { %1333 = vmatpush3.bf16.msra.mxu1 %v1460_v41  ;;  %1076 = vmatpush1.bf16.msra.mxu0 %v1461_v42  ;;  %v219_v42 = vld [vmem:[%s1890_s9] sm:$0x7] }
 0x293   :  { %1334 = vmatprep.subr.bf16.mxu1 %v1462_v43  ;;  %1077 = vmatprep.subr.bf16.mxu0 %v1604_v1  ;;  %v220_v43 = vld [vmem:[%s1891_s10] sm:$0x7] }
 0x296   :  { %1335 = vmatpush3.bf16.msra.mxu1 %v1463_v44  ;;  %1078 = vmatpush1.bf16.msra.mxu0 %v1464_v45  ;;  %v1157_v44 = vrot.slane %v219_v42, %v1752_v10  ;;  %v1161_v45 = vrot.slane %v219_v42, %v1754_v11 }
 0x297   :  { %1336 = vmatprep.subr.bf16.mxu1 %v1465_v46  ;;  %1079 = vmatprep.subr.bf16.mxu0 %v1604_v1  ;;  %v1165_v46 = vrot.slane %v219_v42, %v1761_v17 }
 0x29a   :  { %1337 = vmatpush3.bf16.msra.mxu1 %v1466_v47  ;;  %1080 = vmatpush1.bf16.msra.mxu0 %v1467_v48  ;;  %v1176_v48 = vrot.slane %v220_v43, %v1752_v10 }
 0x29b   :  { %1338 = vmatprep.subr.bf16.mxu1 %v1468_v49  ;;  %1081 = vmatprep.subr.bf16.mxu0 %v1604_v1  ;;  %v1180_v49 = vrot.slane %v220_v43, %v1754_v11 }
 0x29e   :  { %1339 = vmatpush3.bf16.msra.mxu1 %v1469_v52  ;;  %1082 = vmatpush1.bf16.msra.mxu0 %v1470_v53  ;;  %v221_v52 = vld [vmem:[%s1892_s11] sm:$0x7] }
 0x29f   :  { %1340 = vmatprep.subr.bf16.mxu1 %v1471_v55  ;;  %1083 = vmatprep.subr.bf16.mxu0 %v1604_v1 }
 0x2a2   :  { %1341 = vmatpush3.bf16.msra.mxu1 %v1472_v56  ;;  %1084 = vmatpush1.bf16.msra.mxu0 %v1473_v57  ;;  %v1184_v57 = vrot.slane %v220_v43, %v1761_v17 }
 0x2a3   :  { %1085 = vmatprep.subr.bf16.mxu0 %v1604_v1  ;;  %v218_v1 = vld [vmem:[%s1889_s8] sm:$0x7] }
 0x2a4   :  { %v1113_v15 = vrot.slane %v218_v1, %v1752_v10  ;;  %v1117_v16 = vrot.slane %v218_v1, %v1754_v11  ;;  %v1121_v23 = vrot.slane %v218_v1, %v1761_v17 }
 0x2a5   :  { %1062 = vmatmul.mubr.bf16.vlgmr.msra.gmra.mrb[20].mxu1 %v437_v33 }
 0x2a6   :  { %1086 = vmatpush1.bf16.msra.mxu0 %v1474_v58 }
 0x2a9   :  { %1102 = vmatmul.mubr.bf16.vlgmr.msra.gmra.mrb[4].mxu0 %v1834_v14 }
 0x358   :  { %v981_v59 = vpop.f32.mrb[0].mxu0  ;;  %v1022_v60 = vpop.f32.mrb[16].mxu1 }
 0x359   :  { %v982_v61 = vadd.f32 %v981_v59, %v1813_v50  ;;  %v983_v62 = vpop.f32.mrb[1].mxu0  ;;  %v1024_v63 = vpop.f32.mrb[17].mxu1 }
 0x35a   :  { %v984_v0 = vadd.f32 %v983_v62, %v1815_v51  ;;  %v985_v2 = vpop.f32.mrb[2].mxu0  ;;  %v1026_v3 = vpop.f32.mrb[18].mxu1  ;;  %v1202_v62 = vrot.slane %v221_v52, %v1754_v11 }
 0x35b   :  { %v1023_v4 = vadd.f32 %v1022_v60, %v982_v61  ;;  %v986_v5 = vpop.f32.mrb[3].mxu0  ;;  %v1027_v6 = vpop.f32.mrb[19].mxu1  ;;  %v1198_v61 = vrot.slane %v221_v52, %v1752_v10  ;;  %v1206_v3 = vrot.slane %v221_v52, %v1761_v17 }
 0x35c   :  { %v1025_v7 = vadd.f32 %v1024_v63, %v984_v0 }
 0x35d   :  { %v1125_v24 = vadd.f32 %v1113_v15, %v1023_v4 }
 0x35e   :  { %v1126_v25 = vadd.f32 %v1117_v16, %v1025_v7 }
 0x360   :  { %v1128_v30 = vadd.f32 %v1126_v25, %v1125_v24 }
 0x378   :  { %v1342_v8 = vpop.f32.mrb[20].mxu1 }
 0x379   :  { %v1343_v50 = vpop.f32.mrb[21].mxu1 }
 0x37a   :  { %v1344_v18 = vadd.f32 %v1343_v50, %v1342_v8  ;;  %v1345_v20 = vpop.f32.mrb[22].mxu1 }
 0x37b   :  { %v1346_v21 = vpop.f32.mrb[23].mxu1 }
 0x37c   :  { %v1064_v51 = vadd.f32 %v1344_v18, %v1817_v54  ;;  %v1103_v22 = vpop.f32.mrb[4].mxu0  ;;  %v1323_v18 = vld [vmem:[#allocation2] ss:$0 sm:$0xff] }
 0x37d   :  { %v1105_v26 = vpop.f32.mrb[5].mxu0 }
 0x37e   :  { %v1104_v27 = vadd.f32 %v1103_v22, %v1064_v51  ;;  %v1106_v19 = vpop.f32.mrb[6].mxu0 }
 0x37f   :  { %v1107_v28 = vpop.f32.mrb[7].mxu0 }
 0x380   :  { %v1127_v29 = vadd.f32 %v1121_v23, %v1104_v27 }
 0x382   :  { %v1130_v31 = vsel %vm1129_vm4, %v1127_v29, 0.0 }
 0x383   :  { %v1131_v32 = vadd.f32 %v1130_v31, %v1128_v30 }
 0x385   :  { %1132 = vadd.xlane.f32.xlu1 %v1131_v32 }
 0x412   :  { %v1133_v12 = vpop.xlane.xlu1 %1132 }
 0x413   :  { %v1135_v33 = vmul.f32 0.0033333334, %v1133_v12 }
 0x415   :  { %v1136_v14 = vsub.f32 %v1125_v24, %v1135_v33  ;;  %v1137_v54 = vsub.f32 %v1126_v25, %v1135_v33  ;;  %v1138_v9 = vsub.f32 %v1127_v29, %v1135_v33 }
 0x417   :  { %v1139_v34 = vmul.f32 %v1136_v14, %v1136_v14  ;;  %v1140_v13 = vmul.f32 %v1137_v54, %v1137_v54  ;;  %v1141_v35 = vmul.f32 %v1138_v9, %v1138_v9 }
 0x419   :  { %v1142_v36 = vadd.f32 %v1140_v13, %v1139_v34  ;;  %v1143_v37 = vsel %vm1129_vm4, %v1141_v35, 0.0 }
 0x41b   :  { %v1144_v38 = vadd.f32 %v1143_v37, %v1142_v36 }
 0x41d   :  { %1145 = vadd.xlane.f32.xlu1 %v1144_v38 }
 0x4aa   :  { %v1146_v39 = vpop.xlane.xlu1 %1145 }
 0x4ab   :  { %v1147_v40 = vmul.f32 0.0033333334, %v1146_v39 }
 0x4ad   :  { %v1148_v41 = vadd.f32 1e-05, %v1147_v40 }
 0x4af   :  { %1477 = vrsqrt.f32 %v1148_v41 }
 0x4b9   :  { %v1478_v47 = vpop.eup %1477 }
 0x4ba   :  { %v1150_v53 = vmul.f32 %v1478_v47, %v1136_v14  ;;  %v1151_v55 = vmul.f32 %v1478_v47, %v1137_v54  ;;  %v1152_v56 = vmul.f32 %v1478_v47, %v1138_v9 }
 0x4bc   :  { %v1169_v58 = vmul.f32 %v1157_v44, %v1150_v53  ;;  %v1170_v59 = vmul.f32 %v1161_v45, %v1151_v55  ;;  %v1171_v60 = vmul.f32 %v1165_v46, %v1152_v56 }
 0x4be   :  { %v1188_v63 = vadd.f32 %v1176_v48, %v1169_v58  ;;  %v1189_v0 = vadd.f32 %v1180_v49, %v1170_v59  ;;  %v1190_v2 = vadd.f32 %v1184_v57, %v1171_v60 }
 0x4c0   :  { %v1191_v4 = vmax.f32 %v1188_v63, 0.0  ;;  %v1192_v5 = vmax.f32 %v1189_v0, 0.0  ;;  %v1193_v6 = vmax.f32 %v1190_v2, 0.0 }
 0x4c2   :  { %v1210_v7 = vmul.f32 %v1198_v61, %v1191_v4  ;;  %v1211_v1 = vmul.f32 %v1202_v62, %v1192_v5  ;;  %v1212_v8 = vmul.f32 %v1206_v3, %v1193_v6 }
 0x4c4   :  { %v1213_v15 = vadd.f32 %v1211_v1, %v1210_v7  ;;  %v1214_v16 = vsel %vm1129_vm4, %v1212_v8, 0.0 }
 0x4c6   :  { %v1215_v50 = vadd.f32 %v1214_v16, %v1213_v15 }
 0x4c8   :  { %1216 = vadd.xlane.f32.xlu0 %v1215_v50 }
 0x555   :  { %v1217_v10 = vpop.xlane.xlu0 %1216 }
 0x556   :  { %v1224_v11 = vadd.f32 %v1323_v18, %v1217_v10 }
 0x558   :  { %1226 = vst.msk [vmem:[%s1894_s13] sm:$0xff] %vm1225_vm5, %v1224_v11 }
 0x559   :  { %1231 = vsyncpa [#allocation4], 1 }
 0x55a   :  { %1232 = vsyncpa [#allocation6], 1 }
 0x55b   :  { %1233 = vsyncpa [#allocation9], 1 }

</bundles_post_ra>
